<compile_context>
chip_gen: v6e
topology: v6e:2x2x1
jax: 0.10.0
libtpu: 0.0.40
codegen_flags: <defaults>
</compile_context>

<pallas_src>
import jax
import jax.numpy as jnp
from jax.experimental import pallas as pl
from jax.experimental.pallas import tpu as pltpu

NEG_INF = -10000.0  # matches torch.tensor(-10000, dtype=torch.float32)


def _mention_kernel(span_ref, amask_ref, qw_ref, wt_ref, b_ref, out_ref):
    # span_ref:  (TB, W, E)  span token embeddings for TB batch rows
    # amask_ref: (TB, W)     additive mask: 0.0 = valid token, -10000.0 = pad
    # qw_ref:    (1, E)      W.T @ query   (projection hoisted out of attention)
    # wt_ref:    (E, E)      projection weight, pre-transposed (= weight.T)
    # b_ref:     (1, E)      projection bias
    # out_ref:   (TB, E)     pooled mention features
    span = span_ref[...]                                       # (TB, W, E)
    qw = qw_ref[...][None, :, :]                                # (1, 1, E)

    # Attention scores: VPU multiply + lane reduction (avoids a width-1 MXU matmul).
    # The bias·query term is constant along W, so it cancels in the softmax.
    scores = jnp.sum(span * qw, axis=-1) + amask_ref[...]       # (TB, W)

    # Softmax over span length (f32 throughout).
    m = jnp.max(scores, axis=-1, keepdims=True)                 # (TB, 1)
    e = jnp.exp(scores - m)                                     # (TB, W)
    attn = e / jnp.sum(e, axis=-1, keepdims=True)               # (TB, W)

    # Pool the *unprojected* span tokens; since attn sums to 1, projecting the
    # pooled vector equals pooling the projected tokens (exact rewrite).
    pooled = jnp.sum(span * attn[:, :, None], axis=1)           # (TB, E)

    # Single (TB, E) @ (E, E) projection per grid step, weight already transposed.
    out_ref[...] = (
        jnp.dot(pooled, wt_ref[...], preferred_element_type=jnp.float32)
        + b_ref[...]
    )


def mention_feature_extractor(sentence, span, span_lengths, weight, bias, query,
                              *, tb=128):
    """JAX wrapper reproducing MentionFeatureExtractor.forward (attention pooling).

    `sentence` is accepted for signature parity but (as in the PyTorch module)
    does not contribute to the returned features.
    """
    del sentence  # projected in the module but never reaches the output
    B, W, E = span.shape
    f32 = jnp.float32

    span = span.astype(f32)
    weight = weight.astype(f32)
    bias2 = bias.reshape(1, E).astype(f32)
    query1 = query.reshape(E).astype(f32)

    # Hoisted-projection precomputation (wrapper-side, once).
    qw = (weight.T @ query1).reshape(1, E)   # (1, E): W.T @ q
    wt = weight.T                             # (E, E): pooled @ wt == pooled @ weight.T

    # Additive mask: 0 for valid tokens, -10000 for padding.
    mask = (span_lengths > 0).astype(f32).reshape(B, W)
    add_mask = (1.0 - mask) * NEG_INF                            # (B, W)

    # Batch tiling: TB rows per grid step (multiple of 8 for sublane alignment).
    tb = max(8, (min(tb, ((B + 7) // 8) * 8) // 8) * 8)
    b_pad = pl.cdiv(B, tb) * tb
    if b_pad != B:
        span = jnp.pad(span, ((0, b_pad - B), (0, 0), (0, 0)))
        add_mask = jnp.pad(add_mask, ((0, b_pad - B), (0, 0)))

    out = pl.pallas_call(
        _mention_kernel,
        out_shape=jax.ShapeDtypeStruct((b_pad, E), f32),
        grid_spec=pltpu.PrefetchScalarGridSpec(
            num_scalar_prefetch=0,
            grid=(b_pad // tb,),
            in_specs=[
                pl.BlockSpec((tb, W, E), lambda i: (i, 0, 0)),   # span tile
                pl.BlockSpec((tb, W), lambda i: (i, 0)),         # additive mask tile
                pl.BlockSpec((1, E), lambda i: (0, 0)),          # W.T q (resident)
                pl.BlockSpec((E, E), lambda i: (0, 0)),          # W.T   (resident)
                pl.BlockSpec((1, E), lambda i: (0, 0)),          # bias  (resident)
            ],
            out_specs=pl.BlockSpec((tb, E), lambda i: (i, 0)),
        ),
        compiler_params=pltpu.CompilerParams(
            dimension_semantics=("parallel",)),
    )(span, add_mask, qw, wt, bias2)
    return out[:B]


def _reference(span, span_lengths, weight, bias, query):
    # Mirrors the PyTorch module: project every token, then attention-pool.
    proj = jnp.einsum("bwe,fe->bwf", span, weight) + bias
    scores = jnp.einsum("e,bwe->bw", query, proj)
    masked = jnp.where(span_lengths > 0, scores, NEG_INF)
    attn = jax.nn.softmax(masked, axis=1)
    return jnp.einsum("bwe,bw->be", proj, attn)


if __name__ == "__main__":
    B, S, W, E = 16, 16, 8, 32  # batch, sentence len, span max len, hidden dim

    key = jax.random.PRNGKey(0)
    k_sent, k_span, k_w, k_b, k_q = jax.random.split(key, 5)

    sentence = jax.random.normal(k_sent, (B, S, E), dtype=jnp.float32)
    span = jax.random.normal(k_span, (B, W, E), dtype=jnp.float32)
    # Per-token validity mask: row i has 1 + (i % W) valid tokens (deterministic).
    span_lengths = (
        jnp.arange(W)[None, :] < (1 + jnp.arange(B) % W)[:, None]
    ).astype(jnp.int32)

    # Parameters (deterministic).  The module's __init__ zeroes the projection
    # weight, which makes the forward degenerate (output == bias); small random
    # values are used here for a meaningful numerical check — the forward math
    # itself is reproduced exactly.
    weight = 0.02 * jax.random.normal(k_w, (E, E), dtype=jnp.float32)
    bias = 0.02 * jax.random.normal(k_b, (E,), dtype=jnp.float32)
    query = 0.02 * jax.random.normal(k_q, (E,), dtype=jnp.float32)

    # tb=8 -> 2 grid steps so both v7x TensorCores get work at this toy batch.
    out = mention_feature_extractor(sentence, span, span_lengths,
                                    weight, bias, query, tb=8)
    out = jax.block_until_ready(out)

    ref = _reference(span, span_lengths, weight, bias, query)
    assert out.shape == (B, E) and out.dtype == jnp.float32
    assert jnp.allclose(out, ref, atol=1e-5, rtol=1e-4), (out, ref)

    print("KERNEL_OK")
</pallas_src>

<mosaic_0001>
module attributes {stable_mosaic.version = 11 : i64} {
  func.func @_mention_kernel(%arg0: i32, %arg1: memref<8x8x32xf32, #tpu.memory_space<vmem>>, %arg2: memref<8x8xf32, #tpu.memory_space<vmem>>, %arg3: memref<1x32xf32, #tpu.memory_space<vmem>>, %arg4: memref<32x32xf32, #tpu.memory_space<vmem>>, %arg5: memref<1x32xf32, #tpu.memory_space<vmem>>, %arg6: memref<8x32xf32, #tpu.memory_space<vmem>>) attributes {dimension_semantics = [#tpu.dimension_semantics<parallel>], iteration_bounds = array<i64: 2>, scalar_prefetch = 0 : i64, scratch_operands = 0 : i64, tpu.core_type = #tpu.core_type<tc>, window_params = [{transform_indices = @transform_0, window_bounds = array<i64: 8, 8, 32>}, {transform_indices = @transform_1, window_bounds = array<i64: 8, 8>}, {pipeline_mode = #tpu.pipeline_mode<synchronous>, transform_indices = @transform_2, window_bounds = array<i64: 1, 32>}, {pipeline_mode = #tpu.pipeline_mode<synchronous>, transform_indices = @transform_3, window_bounds = array<i64: 32, 32>}, {pipeline_mode = #tpu.pipeline_mode<synchronous>, transform_indices = @transform_4, window_bounds = array<i64: 1, 32>}, {transform_indices = @transform_5, window_bounds = array<i64: 8, 32>}]} {
    %c0 = arith.constant 0 : index
    %c0_0 = arith.constant 0 : index
    %c0_1 = arith.constant 0 : index
    %0 = vector.load %arg1[%c0, %c0_0, %c0_1] : memref<8x8x32xf32, #tpu.memory_space<vmem>>, vector<8x8x32xf32>
    %c0_2 = arith.constant 0 : index
    %c0_3 = arith.constant 0 : index
    %1 = vector.load %arg3[%c0_2, %c0_3] : memref<1x32xf32, #tpu.memory_space<vmem>>, vector<1x32xf32>
    %2 = vector.shape_cast %1 : vector<1x32xf32> to vector<1x1x32xf32>
    %3 = vector.broadcast %2 : vector<1x1x32xf32> to vector<8x8x32xf32>
    %4 = arith.mulf %0, %3 : vector<8x8x32xf32>
    %cst = arith.constant dense<0.000000e+00> : vector<8x8xf32>
    %5 = vector.multi_reduction <add>, %4, %cst [2] : vector<8x8x32xf32> to vector<8x8xf32>
    %c0_4 = arith.constant 0 : index
    %c0_5 = arith.constant 0 : index
    %6 = vector.load %arg2[%c0_4, %c0_5] : memref<8x8xf32, #tpu.memory_space<vmem>>, vector<8x8xf32>
    %7 = arith.addf %5, %6 : vector<8x8xf32>
    %cst_6 = arith.constant dense<0xFF800000> : vector<8xf32>
    %8 = vector.multi_reduction <maximumf>, %7, %cst_6 [1] : vector<8x8xf32> to vector<8xf32>
    %9 = vector.shape_cast %8 : vector<8xf32> to vector<8x1xf32>
    %10 = vector.broadcast %9 : vector<8x1xf32> to vector<8x8xf32>
    %11 = arith.subf %7, %10 : vector<8x8xf32>
    %12 = math.exp %11 : vector<8x8xf32>
    %cst_7 = arith.constant dense<0.000000e+00> : vector<8xf32>
    %13 = vector.multi_reduction <add>, %12, %cst_7 [1] : vector<8x8xf32> to vector<8xf32>
    %14 = vector.shape_cast %13 : vector<8xf32> to vector<8x1xf32>
    %15 = vector.broadcast %14 : vector<8x1xf32> to vector<8x8xf32>
    %16 = arith.divf %12, %15 : vector<8x8xf32>
    %17 = vector.shape_cast %16 : vector<8x8xf32> to vector<8x8x1xf32>
    %18 = vector.broadcast %17 : vector<8x8x1xf32> to vector<8x8x32xf32>
    %19 = arith.mulf %0, %18 : vector<8x8x32xf32>
    %cst_8 = arith.constant dense<0.000000e+00> : vector<8x32xf32>
    %20 = vector.multi_reduction <add>, %19, %cst_8 [1] : vector<8x8x32xf32> to vector<8x32xf32>
    %c0_9 = arith.constant 0 : index
    %c0_10 = arith.constant 0 : index
    %21 = vector.load %arg4[%c0_9, %c0_10] : memref<32x32xf32, #tpu.memory_space<vmem>>, vector<32x32xf32>
    %cst_11 = arith.constant dense<0.000000e+00> : vector<8x32xf32>
    %22 = tpu.matmul %20, %21, %cst_11 {dimension_numbers = #tpu.dot_dimension_numbers<[1], [0], [0], [1], [0, 0, 1, 1], [], []>} : vector<8x32xf32>, vector<32x32xf32>, vector<8x32xf32> -> vector<8x32xf32>
    %c0_12 = arith.constant 0 : index
    %c0_13 = arith.constant 0 : index
    %23 = vector.load %arg5[%c0_12, %c0_13] : memref<1x32xf32, #tpu.memory_space<vmem>>, vector<1x32xf32>
    %24 = vector.broadcast %23 : vector<1x32xf32> to vector<8x32xf32>
    %25 = arith.addf %22, %24 : vector<8x32xf32>
    %c0_14 = arith.constant 0 : index
    %c0_15 = arith.constant 0 : index
    %26 = vector.load %arg6[%c0_14, %c0_15] : memref<8x32xf32, #tpu.memory_space<vmem>>, vector<8x32xf32>
    tpu.vector_store %arg6[%c0_14, %c0_15], %25 {strides = array<i32>} : memref<8x32xf32, #tpu.memory_space<vmem>>, vector<8x32xf32>,
    return
  }
  func.func @transform_0(%arg0: i32) -> (i32, i32, i32) {
    %c0_i32 = arith.constant 0 : i32
    %c0_i32_0 = arith.constant 0 : i32
    %c0_i32_1 = arith.constant 0 : i32
    return %arg0, %c0_i32, %c0_i32_0 : i32, i32, i32
  }
  func.func @transform_1(%arg0: i32) -> (i32, i32) {
    %c0_i32 = arith.constant 0 : i32
    %c0_i32_0 = arith.constant 0 : i32
    return %arg0, %c0_i32 : i32, i32
  }
  func.func @transform_2(%arg0: i32) -> (i32, i32) {
    %c0_i32 = arith.constant 0 : i32
    %c0_i32_0 = arith.constant 0 : i32
    %c0_i32_1 = arith.constant 0 : i32
    return %c0_i32, %c0_i32_0 : i32, i32
  }
  func.func @transform_3(%arg0: i32) -> (i32, i32) {
    %c0_i32 = arith.constant 0 : i32
    %c0_i32_0 = arith.constant 0 : i32
    %c0_i32_1 = arith.constant 0 : i32
    return %c0_i32, %c0_i32_0 : i32, i32
  }
  func.func @transform_4(%arg0: i32) -> (i32, i32) {
    %c0_i32 = arith.constant 0 : i32
    %c0_i32_0 = arith.constant 0 : i32
    %c0_i32_1 = arith.constant 0 : i32
    return %c0_i32, %c0_i32_0 : i32, i32
  }
  func.func @transform_5(%arg0: i32) -> (i32, i32) {
    %c0_i32 = arith.constant 0 : i32
    %c0_i32_0 = arith.constant 0 : i32
    return %arg0, %c0_i32 : i32, i32
  }
}

</mosaic_0001>

<bundles_post_ra>
// kernel: tpu_custom_call.1
= control target key start
LH: loop header
LB: loop body
LE: loop exit
PB: predicated region body
PF: predicated region fallthrough
CT: control target
= control target key end

     0   :  { %10 = vsyncpa [#allocation3], 0  ;;  %s1637_s0 = inlined_call_operand.hbm [shape: f32[16,8,32], index: 0, kind: input, shape index: {}]   ;;  %s1638_s1 = inlined_call_operand.vmem [shape: f32[16,8], index: 1, kind: input, shape index: {}]   ;;  %s1639_s2 = inlined_call_operand.vmem [shape: f32[1,32], index: 2, kind: input, shape index: {}]   ;;  %s1640_s3 = inlined_call_operand.hbm [shape: f32[32,32], index: 3, kind: input, shape index: {}]   ;;  %s1641_s4 = inlined_call_operand.vmem [shape: f32[1,32], index: 4, kind: input, shape index: {}]   ;;  %s1642_s5 = inlined_call_operand.hbm [shape: f32[16,32], index: 5, kind: output, shape index: {}]  }
   0x1   :  { %12 = vsyncpa [#allocation3 + $0x1], 0 }
   0x2   :  { %13 = vsyncpa [#allocation6], 0 }
   0x3   :  { %14 = vsyncpa [#allocation4], 0 }
   0x4   :  { %16 = vsyncpa [#allocation4 + $0x1], 0  ;;  %s1283_s18 = smov 0   ;;  %s1285_s19 = smov 0  }
   0x5   :  { %s1287_s20 = smov 0   ;;  %s1289_s21 = smov 0  }
   0x6 LB: > { %s1304_s22 = sadd.s32 4294967295, %s1243_s21   ;;  %s989_s23 = sadd.s32 4294967294, %s1243_s21   ;;  %s1243_s21 = sphi %s1289_s21, %s1666_s21   ;;  %s1239_s20 = sphi %s1287_s20, %s1665_s20   ;;  %s1235_s19 = sphi %s1285_s19, %s1664_s19   ;;  %s1231_s18 = sphi %s1283_s18, %s1663_s18  }
   0x7   : > { %p42_p0 = scmp.ne.s32.totalorder %s1235_s19, %s1231_s18  ;;  %p1643_p1 = scmp.eq.s32.totalorder %s1304_s22, 0 }
   0x8   : > { %p161_p3 = scmp.eq.s32.totalorder %s989_s23, 1  ;;  %p990_p5 = scmp.ge.s32.totalorder %s1243_s21, 1 }
   0x9   : > { %p1313_p4 = por %p1643_p1, %p42_p0  ;;  %p168_p7 = scmp.lt.s32.totalorder %s1243_s21, 3 }
   0xa   : > { %p1318_p6 = por %p161_p3, %p42_p0  ;;  %s1245_s27 = smov [#allocation5]  }
   0xb   : > { %s1648_s24 = scalar_select %p1313_p4, 1, 0 }
   0xc   : > { %s1649_s25 = scalar_select %p1318_p6, 1, 0 }
   0xd   : > { %p1323_p8 = pnand %p990_p5, %p168_p7  ;;  %s183_s28 = sshll.u32 %s1245_s27, 4  ;;  %s184_s28 = int_to_ptr.vmem [resolvable:$true] %s183_s28 }
   0xe   : > { %s1337_s30 = sadd.s32 1, %s1243_s21   ;;  %s29_s6 = sadd.s32 1, %s1239_s20 }
   0xf   : > { %s1650_s26 = scalar_select %p1323_p8, 1, 0 }
  0x10   : > { %p1033_p9 = pneg %p1323_p8  ;;  %s26_s7 = ssub.s32 %s1243_s21, %s1337_s30 }
  0x11   : > { %s1132_s8 = scalar_lea.vmem %s184_s28, 512  ;;  %p1140_p5 = scmp.lt.s32.totalorder %s184_s28, %s184_s28 }
  0x12   : > { %p1332_p11 = pnand %p1033_p9, %p1643_p1  ;;  %p1133_p13 = scmp.ne.s32.totalorder %s184_s28, %s1132_s8 }
  0x13   : > { %p1141_p7 = scmp.lt.s32.totalorder %s1132_s8, %s1132_s8 }
  0x14   : > { %p1123_p12 = pneg %p1332_p11 }
  0x15   : > { %p1142_p10 = por %p1141_p7, %p1140_p5 }
  0x16   : > { %p1135_p0 = pnand %p1133_p13, %p1123_p12 }
  0x18   : > { %p1136_p3 = pneg %p1135_p0 }
  0x1a   : > { %p1143_p2 = pnand %p1142_p10, %p1136_p3 }
  0x1c   : > { %1146 = shalt.err (!%p1143_p2)
}
  0x1d   : > { %s1644_s9 = smov 128   ;;  %s1247_s10 = smov 8  }
  0x1e   : > { %1036 = dma.hbm_to_vmem [thread:$0]  (!%p1332_p11), %s1640_s3, 512, %s184_s28, [#allocation6], %s1644_s9, %s1644_s9, %s1247_s10  }
  0x1f   : > { %p27_p2 = scmp.eq.s32.totalorder %s26_s7, 0  ;;  %p36_p9 = scmp.ne.s32.totalorder %s1239_s20, %s1235_s19 }
  0x20   : > { %p37_p10 = scmp.eq.s32.totalorder %s1243_s21, 0  ;;  %p1046_p12 = scmp.lt.s32.totalorder %s1243_s21, 2 }
  0x21   : > { %s1357_s13 = scalar_select %p27_p2, %s1239_s20, %s29_s6  }
  0x22   : > { %p38_p13 = por %p37_p10, %p36_p9  ;;  %p1652_p0 = scmp.eq.s32.totalorder %s1304_s22, 1 }
  0x23   : > { %s200_s15 = sand.u32 1, %s1239_s20   ;;  %s1008_s16 = sshll.u32 %s1243_s21, 10 }
  0x24   : > { %p1361_p3 = por %p1652_p0, %p36_p9  ;;  %s993_s17 = sshll.u32 %s200_s15, 6 }
  0x25   : > { %s1370_s29 = scalar_lea.hbm %s1637_s0, %s1008_s16  ;;  %s204_s28 = scalar_lea.vmem [#allocation2], %s993_s17 }
  0x26   : > { %s1653_s14 = scalar_select %p1361_p3, 1, 0 }
  0x27   : > { %s211_s6 = sshll.u32 %s204_s28, 4  ;;  %p1372_p11 = pnand %p1046_p12, %p38_p13  ;;  %s1376_s6 = int_to_ptr.vmem [resolvable:$true] %s211_s6 }
  0x28   : > { %s1378_s8 = scalar_lea.sflag [#allocation3], %s200_s15  ;;  %s1147_s11 = scalar_lea.hbm %s1370_s29, 1024 }
  0x29   : > { %p1148_p5 = scmp.ne.s32.totalorder %s1370_s29, %s1147_s11  ;;  %p1149_p7 = pneg %p1372_p11 }
  0x2a   : > { %s1152_s17 = scalar_lea.hbm %s1637_s0, 2048  ;;  %p1153_p10 = scmp.lt.s32.totalorder %s1370_s29, %s1637_s0 }
  0x2b   : > { %p1150_p2 = pnand %p1149_p7, %p1148_p5  ;;  %p1154_p12 = scmp.lt.s32.totalorder %s1152_s17, %s1147_s11 }
  0x2d   : > { %p1151_p9 = pneg %p1150_p2  ;;  %p1155_p13 = por %p1154_p12, %p1153_p10 }
  0x2f   : > { %p1156_p0 = pnand %p1155_p13, %p1151_p9 }
  0x31   : > { %1159 = shalt.err (!%p1156_p0)
}
  0x32   : > { %s1160_s15 = scalar_lea.vmem %s1376_s6, 1024  ;;  %s1248_s28 = smov [#allocation2]  }
  0x33   : > { %p1161_p1 = scmp.ne.s32.totalorder %s1376_s6, %s1160_s15  ;;  %s1165_s9 = sshll.u32 %s1248_s28, 4  ;;  %s1166_s9 = int_to_ptr.vmem [resolvable:$false] %s1165_s9 }
  0x34   : > { %s1167_s12 = scalar_lea.vmem %s1166_s9, 2048  ;;  %p1168_p2 = scmp.lt.s32.totalorder %s1376_s6, %s1166_s9 }
  0x35   : > { %p1163_p6 = pnand %p1161_p1, %p1149_p7  ;;  %p1169_p3 = scmp.lt.s32.totalorder %s1167_s12, %s1160_s15 }
  0x37   : > { %p1164_p5 = pneg %p1163_p6  ;;  %p1170_p4 = por %p1169_p3, %p1168_p2 }
  0x39   : > { %p1171_p8 = pnand %p1170_p4, %p1164_p5 }
  0x3b   : > { %1174 = shalt.err (!%p1171_p8)
}
  0x3c   : > { %s1655_s11 = smov 128   ;;  %p1656_p1 = scmp.ne.s32.totalorder %s1650_s26, 0 }
  0x3d   : > { %1040 = dma.hbm_to_vmem [thread:$0]  (!%p1372_p11), %s1370_s29, 1024, %s1376_s6, %s1378_s8, %s1655_s11, %s1655_s11, %s1247_s10  }
  0x3e   : > { %230 = sbr.rel (%p1656_p1) target bundleno = 1218 (0x4c2), region = 40  ;;  %s1405_s16 = sand.u32 (!%p1656_p1), 1, %s1235_s19  }
  0x3f   : > { %s997_s9 = sshll.u32 (!%p1656_p1), %s1405_s16, 6  ;;  %s233_s17 = scalar_lea.sflag (!%p1656_p1), [#allocation3], %s1405_s16 }
  0x40   : > { %s236_s23 = scalar_lea.vmem (!%p1656_p1), [#allocation2], %s997_s9  ;;  %p1657_p4 = scmp.ne.s32.totalorder (!%p1656_p1), %s1648_s24, 0 }
  0x43   : > { %1218 = dma.done.wait (%p1657_p4), %s233_s17, 1024  }
  0x44   : > { %1220 = vsyncadd (%p1657_p4), %s233_s17, 4294966272  ;;  %p1658_p6 = scmp.eq.s32.totalorder %s1304_s22, 0 }
  0x46   : > { %1222 = dma.done.wait (%p1658_p6), [#allocation6], 512   ;;  %p1659_p8 = pmov %p1658_p6 }
  0x47   : > { %v326_v0 = vlaneseq  ;;  %v1419_v4 = vld [vmem:[%s236_s23 + $0x10] sm:$0xff]  ;;  %v1001_v5 = vld [vmem:[%s1639_s2] ss:$0 sm:$0xff]  ;;  %vm299_vm0 = vcmask 261120   ;;  %v1428_v9 = vld [vmem:[%s236_s23 + $0x18] sm:$0xff]  ;;  %p272_p3 = scmp.lt.s32.totalorder %s1304_s22, 1 }
  0x48   : > { %1224 = vsyncadd (%p1659_p8), [#allocation6], 4294966784  ;;  %v1424_v6 = vld [vmem:[%s236_s23] sm:$0xff]  ;;  %v293_v7 = vmul.f32 %v1001_v5, %v1419_v4  ;;  %v1430_v10 = vld [vmem:[%s236_s23 + $0x8] sm:$0xff]  ;;  %v294_v11 = vmul.f32 %v1001_v5, %v1428_v9  ;;  %v1249_v34 = vmov 0   ;;  %vm464_vm1 = vcmask 1041409  }
  0x49   : > { %v327_v1 = vshrl.u32 %v326_v0, 7  ;;  %v431_v2 = vand.u32 127, %v326_v0  ;;  %v291_v8 = vmul.f32 %v1001_v5, %v1424_v6  ;;  %v292_v12 = vmul.f32 %v1001_v5, %v1430_v10  ;;  %v1434_v13 = vld [vmem:[%s236_s23 + $0x28] sm:$0xff]  ;;  %v1436_v14 = vld [vmem:[%s236_s23 + $0x20] sm:$0xff]  ;;  %v1444_v21 = vld [vmem:[%s236_s23 + $0x38] sm:$0xff]  ;;  %s273_s24 = scalar_select %p272_p3, %s1304_s22, 1  ;;  %1088 = vset.pattern.permute.xlu1 %v1249_v34  ;;  %1087 = vset.pattern.permute.xlu0 %v1249_v34 }
  0x4a   : > { %v306_v15 = vsel %vm299_vm0, %v293_v7, 0.0  ;;  %v309_v17 = vsel %vm299_vm0, %v294_v11, 0.0  ;;  %v296_v19 = vmul.f32 %v1001_v5, %v1434_v13  ;;  %v295_v20 = vmul.f32 %v1001_v5, %v1436_v14  ;;  %v1446_v22 = vld [vmem:[%s236_s23 + $0x30] sm:$0xff]  ;;  %s999_s27 = sshll.u32 %s1405_s16, 3  ;;  %s1005_s12 = sshll.u32 %s1304_s22, 7 }
  0x4b   : > { %v1417_v3 = vsub.s32 %v431_v2, %v327_v1  ;;  %v300_v16 = vsel %vm299_vm0, %v291_v8, 0.0  ;;  %307 = vadd.xlane.f32.xlu1 %v306_v15  ;;  %v303_v18 = vsel %vm299_vm0, %v292_v12, 0.0  ;;  %v298_v25 = vmul.f32 %v1001_v5, %v1444_v21  ;;  %s1000_s29 = sshll.u32 %s273_s24, 3  ;;  %s270_s11 = scalar_lea.vmem [#allocation7], %s999_s27 }
  0x4c   : > { %301 = vadd.xlane.f32.xlu0 %v300_v16  ;;  %v315_v23 = vsel %vm299_vm0, %v296_v19, 0.0  ;;  %v312_v24 = vsel %vm299_vm0, %v295_v20, 0.0  ;;  %v297_v26 = vmul.f32 %v1001_v5, %v1446_v22  ;;  %s275_s8 = scalar_lea.vmem %s1638_s1, %s1000_s29  ;;  %v1459_v29 = vsub.s32 1, %v327_v1  ;;  %s897_s9 = sshll.u32 %s270_s11, 4  ;;  %s898_s9 = int_to_ptr.vmem [resolvable:$true] %s897_s9 }
  0x4d   : > { %v321_v27 = vsel %vm299_vm0, %v298_v25, 0.0  ;;  %v324_v30 = vld [vmem:[%s275_s8] sm:$0xff]  ;;  %v1462_v32 = vsub.s32 2, %v327_v1  ;;  %v1464_v33 = vsub.s32 0, %v327_v1  ;;  %v1467_v36 = vsub.s32 3, %v327_v1  ;;  %s1599_s26 = scalar_lea.hbm %s1642_s5, %s1005_s12  ;;  %s884_s10 = scalar_lea.sflag [#allocation4], %s1405_s16 }
  0x4e   : > { %v318_v28 = vsel %vm299_vm0, %v297_v26, 0.0  ;;  %v336_v31 = vrot.slane %v324_v30, %v1459_v29  ;;  %v1470_v38 = vsub.s32 4, %v327_v1  ;;  %v1473_v40 = vsub.s32 5, %v327_v1  ;;  %s1175_s24 = scalar_lea.vmem %s898_s9, 128  ;;  %p1660_p7 = scmp.ne.s32.totalorder %s1653_s14, 0 }
  0x4f   : > { %310 = vadd.xlane.f32.xlu1 %v309_v17  ;;  %v343_v35 = vrot.slane %v324_v30, %v1462_v32  ;;  %v329_v37 = vrot.slane %v324_v30, %v1464_v33  ;;  %v350_v39 = vrot.slane %v324_v30, %v1467_v36  ;;  %v1476_v42 = vsub.s32 6, %v327_v1  ;;  %p1176_p11 = scmp.ne.s32.totalorder %s898_s9, %s1175_s24  ;;  %s1252_s22 = smov [#allocation7]  }
  0x50   : > { %304 = vadd.xlane.f32.xlu0 %v303_v18  ;;  %v357_v41 = vrot.slane %v324_v30, %v1470_v38  ;;  %v364_v43 = vrot.slane %v324_v30, %v1473_v40  ;;  %v1479_v44 = vsub.s32 7, %v327_v1  ;;  %vm466_vm2 = vcmask 1042434   ;;  %s1179_s29 = sshll.u32 %s1252_s22, 4  ;;  %s1180_s29 = int_to_ptr.vmem [resolvable:$false] %s1179_s29 }
  0x51   : > { %v371_v45 = vrot.slane %v324_v30, %v1476_v42  ;;  %vm468_vm3 = vcmask 1043459   ;;  %vm470_vm4 = vcmask 1044484   ;;  %vm472_vm5 = vcmask 1045509   ;;  %p1177_p9 = pnand %p1176_p11, %p1660_p7  ;;  %s1181_s6 = scalar_lea.vmem %s1180_s29, 256 }
  0x52   : > { %v378_v46 = vrot.slane %v324_v30, %v1479_v44  ;;  %vm474_vm6 = vcmask 1046534   ;;  %vm476_vm7 = vcmask 1047559   ;;  %vm479_vm8 = vcmask 64512   ;;  %p1182_p12 = scmp.lt.s32.totalorder %s898_s9, %s1180_s29  ;;  %p1183_p13 = scmp.lt.s32.totalorder %s1181_s6, %s1175_s24 }
  0x53   : > { %316 = vadd.xlane.f32.xlu1 %v315_v23  ;;  %vm1251_vm9 = vmmov 0   ;;  %p1178_p10 = pneg %p1177_p9 }
  0x54   : > { %313 = vadd.xlane.f32.xlu0 %v312_v24  ;;  %p1184_p0 = por %p1183_p13, %p1182_p12 }
  0x56   : > { %p1185_p5 = pnand %p1184_p0, %p1178_p10 }
  0x57   : > { %322 = vadd.xlane.f32.xlu1 %v321_v27 }
  0x58   : > { %319 = vadd.xlane.f32.xlu0 %v318_v28 }
  0x68   : > { %338 = vbcast.lane.b32.xlu1 %v336_v31, 256 }
  0x6c   : > { %345 = vbcast.lane.b32.xlu1 %v343_v35, 256 }
  0x6e   : > { %331 = vbcast.lane.b32.xlu0 %v329_v37, 256 }
  0x70   : > { %352 = vbcast.lane.b32.xlu1 %v350_v39, 256 }
  0x72   : > { %359 = vbcast.lane.b32.xlu0 %v357_v41, 256 }
  0x74   : > { %366 = vbcast.lane.b32.xlu1 %v364_v43, 256 }
  0x76   : > { %373 = vbcast.lane.b32.xlu0 %v371_v45, 256 }
  0x78   : > { %380 = vbcast.lane.b32.xlu1 %v378_v46, 256 }
  0xd4   : > { %v308_v47 = vpop.xlane.xlu1 %307 }
  0xd5   : > { %v302_v48 = vpop.xlane.xlu0 %301 }
  0xd8   : > { %v311_v49 = vpop.xlane.xlu1 %310 }
  0xd9   : > { %v305_v50 = vpop.xlane.xlu0 %304 }
  0xdc   : > { %v317_v51 = vpop.xlane.xlu1 %316 }
  0xdd   : > { %v314_v52 = vpop.xlane.xlu0 %313 }
  0xe0   : > { %v323_v53 = vpop.xlane.xlu1 %322 }
  0xe1   : > { %v320_v54 = vpop.xlane.xlu0 %319 }
  0xe4   : > { %v339_v55 = vpop.permute.xlu1 %338 }
  0xe5   : > { %v332_v56 = vpop.permute.xlu0 %331  ;;  %v391_v57 = vadd.f32 %v339_v55, %v305_v50 }
  0xe6   : > { %v390_v58 = vadd.f32 %v332_v56, %v302_v48 }
  0xe7   : > { %410 = vperm.xlu1 %1088, %v391_v57  }
  0xe8   : > { %407 = vperm.xlu0 %1087, %v390_v58   ;;  %v346_v59 = vpop.permute.xlu1 %345 }
  0xe9   : > { %v360_v60 = vpop.permute.xlu0 %359  ;;  %v392_v61 = vadd.f32 %v346_v59, %v308_v47 }
  0xea   : > { %v394_v63 = vadd.f32 %v360_v60, %v314_v52 }
  0xeb   : > { %413 = vperm.xlu1 %1088, %v392_v61  }
  0xec   : > { %v353_v62 = vpop.permute.xlu1 %352 }
  0xed   : > { %v393_v0 = vadd.f32 %v353_v62, %v311_v49  ;;  %v374_v1 = vpop.permute.xlu0 %373 }
  0xee   : > { %v1483_v5 = vadd.f32 %v374_v1, %v320_v54 }
  0xef   : > { %416 = vperm.xlu0 %1087, %v393_v0   ;;  %419 = vperm.xlu1 %1088, %v394_v63  }
  0xf0   : > { %v367_v2 = vpop.permute.xlu1 %366 }
  0xf1   : > { %v395_v7 = vadd.f32 %v367_v2, %v317_v51 }
  0xf3   : > { %422 = vperm.xlu0 %1087, %v395_v7   ;;  %425 = vperm.xlu1 %1088, %v1483_v5  }
  0xf4   : > { %v381_v8 = vpop.permute.xlu1 %380 }
  0xf5   : > { %v1486_v11 = vadd.f32 %v381_v8, %v323_v53 }
  0xf7   : > { %428 = vperm.xlu0 %1087, %v1486_v11  }
 0x162   : > { %v411_v12 = vpop.permute.xlu1 %410 }
 0x163   : > { %v408_v15 = vpop.permute.xlu0 %407  ;;  %v439_v17 = vrot.slane %v411_v12, %v1417_v3 }
 0x164   : > { %v435_v18 = vrot.slane %v408_v15, %v1417_v3 }
 0x166   : > { %v414_v16 = vpop.permute.xlu1 %413  ;;  %v465_v24 = vsel %vm464_vm1, %v439_v17, %v435_v18 }
 0x167   : > { %v443_v19 = vrot.slane %v414_v16, %v1417_v3 }
 0x169   : > { %v467_v26 = vsel %vm466_vm2, %v443_v19, %v465_v24 }
 0x16a   : > { %v420_v20 = vpop.permute.xlu1 %419  ;;  %v417_v23 = vpop.permute.xlu0 %416 }
 0x16b   : > { %v447_v25 = vrot.slane %v417_v23, %v1417_v3  ;;  %v451_v27 = vrot.slane %v420_v20, %v1417_v3 }
 0x16d   : > { %v469_v28 = vsel %vm468_vm3, %v447_v25, %v467_v26 }
 0x16e   : > { %v426_v30 = vpop.permute.xlu1 %425  ;;  %v423_v31 = vpop.permute.xlu0 %422  ;;  %v471_v37 = vsel %vm470_vm4, %v451_v27, %v469_v28 }
 0x16f   : > { %v455_v34 = vrot.slane %v423_v31, %v1417_v3  ;;  %v459_v35 = vrot.slane %v426_v30, %v1417_v3 }
 0x171   : > { %v473_v39 = vsel %vm472_vm5, %v455_v34, %v471_v37 }
 0x172   : > { %v429_v41 = vpop.permute.xlu0 %428  ;;  %v475_v45 = vsel %vm474_vm6, %v459_v35, %v473_v39 }
 0x173   : > { %v463_v43 = vrot.slane %v429_v41, %v1417_v3 }
 0x175   : > { %v477_v46 = vsel %vm476_vm7, %v463_v43, %v475_v45 }
 0x176   : > { %v480_v47 = vsel %vm479_vm8, %v477_v46, -inf }
 0x177   : > { %481 = vmax.xlane.f32.xlu1 %v480_v47 }
 0x200   : > { %v482_v48 = vpop.xlane.xlu1 %481 }
 0x201   : > { %v487_v49 = vrot.slane %v482_v48, %v1464_v33  ;;  %v491_v50 = vrot.slane %v482_v48, %v1459_v29  ;;  %v495_v51 = vrot.slane %v482_v48, %v1462_v32  ;;  %v499_v55 = vrot.slane %v482_v48, %v1467_v36 }
 0x202   : > { %v503_v60 = vrot.slane %v482_v48, %v1470_v38  ;;  %v507_v2 = vrot.slane %v482_v48, %v1473_v40  ;;  %v511_v15 = vrot.slane %v482_v48, %v1476_v42 }
 0x203   : > { %v524_v52 = vsub.f32 %v390_v58, %v487_v49  ;;  %v525_v53 = vsub.f32 %v391_v57, %v491_v50  ;;  %v526_v56 = vsub.f32 %v392_v61, %v495_v51  ;;  %v527_v62 = vsub.f32 %v393_v0, %v499_v55 }
 0x204   : > { %v528_v8 = vsub.f32 %v394_v63, %v503_v60  ;;  %v529_v58 = vsub.f32 %v395_v7, %v507_v2  ;;  %v515_v61 = vrot.slane %v482_v48, %v1479_v44  ;;  %v530_v0 = vsub.f32 %v1483_v5, %v511_v15 }
 0x205   : > { %v532_v54 = vmul.f32 1.442695, %v524_v52  ;;  %v534_v59 = vmul.f32 1.442695, %v525_v53  ;;  %v536_v1 = vmul.f32 1.442695, %v526_v56 }
 0x206   : > { %v538_v12 = vmul.f32 1.442695, %v527_v62  ;;  %v540_v57 = vmul.f32 1.442695, %v528_v8  ;;  %v542_v17 = vmul.f32 1.442695, %v529_v58  ;;  %v531_v63 = vsub.f32 %v1486_v11, %v515_v61 }
 0x207   : > { %1089 = vpow2.f32 %v532_v54  ;;  %v544_v7 = vmul.f32 1.442695, %v530_v0 }
 0x208   : > { %1091 = vpow2.f32 %v534_v59  ;;  %v546_v20 = vmul.f32 1.442695, %v531_v63 }
 0x209   : > { %1093 = vpow2.f32 %v536_v1 }
 0x20a   : > { %1095 = vpow2.f32 %v538_v12 }
 0x20b   : > { %1097 = vpow2.f32 %v540_v57 }
 0x20c   : > { %1099 = vpow2.f32 %v542_v17 }
 0x20d   : > { %1101 = vpow2.f32 %v544_v7 }
 0x20e   : > { %1103 = vpow2.f32 %v546_v20  ;;  %v787_v20 = vld [vmem:[#allocation5 + $0x18] sm:$0xff] }
 0x214   : > { %v1512_v16 = vpop.eup %1089 }
 0x215   : > { %557 = vperm.xlu0 %1087, %v1512_v16   ;;  %v1517_v18 = vpop.eup %1091 }
 0x216   : > { %v1521_v19 = vpop.eup %1093 }
 0x217   : > { %v1524_v23 = vpop.eup %1095 }
 0x218   : > { %v1098_v5 = vpop.eup %1097 }
 0x219   : > { %560 = vperm.xlu0 %1087, %v1517_v18   ;;  %v1527_v24 = vpop.eup %1099 }
 0x21a   : > { %v1530_v11 = vpop.eup %1101 }
 0x21b   : > { %v1533_v25 = vpop.eup %1103 }
 0x21d   : > { %563 = vperm.xlu0 %1087, %v1521_v19  }
 0x221   : > { %566 = vperm.xlu0 %1087, %v1524_v23  }
 0x225   : > { %569 = vperm.xlu0 %1087, %v1098_v5  }
 0x229   : > { %572 = vperm.xlu0 %1087, %v1527_v24  }
 0x22d   : > { %575 = vperm.xlu0 %1087, %v1530_v11  }
 0x231   : > { %578 = vperm.xlu0 %1087, %v1533_v25  }
 0x290   : > { %v558_v26 = vpop.permute.xlu0 %557 }
 0x291   : > { %v583_v39 = vrot.slane %v558_v26, %v1417_v3 }
 0x294   : > { %v561_v27 = vpop.permute.xlu0 %560 }
 0x295   : > { %v587_v35 = vrot.slane %v561_v27, %v1417_v3 }
 0x297   : > { %v612_v46 = vsel %vm464_vm1, %v587_v35, %v583_v39 }
 0x298   : > { %v564_v28 = vpop.permute.xlu0 %563 }
 0x299   : > { %v591_v37 = vrot.slane %v564_v28, %v1417_v3 }
 0x29b   : > { %v613_v48 = vsel %vm466_vm2, %v591_v37, %v612_v46 }
 0x29c   : > { %v567_v30 = vpop.permute.xlu0 %566 }
 0x29d   : > { %v595_v41 = vrot.slane %v567_v30, %v1417_v3 }
 0x29f   : > { %v614_v50 = vsel %vm468_vm3, %v595_v41, %v613_v48 }
 0x2a0   : > { %v570_v31 = vpop.permute.xlu0 %569 }
 0x2a1   : > { %v599_v43 = vrot.slane %v570_v31, %v1417_v3 }
 0x2a3   : > { %v615_v51 = vsel %vm470_vm4, %v599_v43, %v614_v50 }
 0x2a4   : > { %v573_v34 = vpop.permute.xlu0 %572 }
 0x2a5   : > { %v603_v47 = vrot.slane %v573_v34, %v1417_v3 }
 0x2a7   : > { %v616_v53 = vsel %vm472_vm5, %v603_v47, %v615_v51 }
 0x2a8   : > { %v576_v45 = vpop.permute.xlu0 %575 }
 0x2a9   : > { %v607_v49 = vrot.slane %v576_v45, %v1417_v3 }
 0x2ab   : > { %v617_v55 = vsel %vm474_vm6, %v607_v49, %v616_v53 }
 0x2ac   : > { %v579_v52 = vpop.permute.xlu0 %578 }
 0x2ad   : > { %v611_v54 = vrot.slane %v579_v52, %v1417_v3 }
 0x2af   : > { %v618_v56 = vsel %vm476_vm7, %v611_v54, %v617_v55 }
 0x2b0   : > { %v620_v59 = vsel %vm479_vm8, %v618_v56, 0.0 }
 0x2b1   : > { %621 = vadd.xlane.f32.xlu0 %v620_v59 }
 0x33a   : > { %v622_v60 = vpop.xlane.xlu0 %621 }
 0x33b   : > { %v643_v62 = vrot.slane %v622_v60, %v1470_v38  ;;  %v627_v1 = vrot.slane %v622_v60, %v1464_v33  ;;  %v631_v2 = vrot.slane %v622_v60, %v1459_v29  ;;  %v635_v8 = vrot.slane %v622_v60, %v1462_v32 }
 0x33c   : > { %v639_v3 = vrot.slane %v622_v60, %v1467_v36  ;;  %v647_v12 = vrot.slane %v622_v60, %v1473_v40  ;;  %v651_v33 = vrot.slane %v622_v60, %v1476_v42  ;;  %v655_v32 = vrot.slane %v622_v60, %v1479_v44 }
 0x33d   : > { %1105 = vrcp.f32 %v643_v62 }
 0x33e   : > { %1107 = vrcp.f32 %v627_v1 }
 0x33f   : > { %1109 = vrcp.f32 %v631_v2 }
 0x340   : > { %1111 = vrcp.f32 %v635_v8 }
 0x341   : > { %1113 = vrcp.f32 %v639_v3 }
 0x342   : > { %1115 = vrcp.f32 %v647_v12 }
 0x343   : > { %1117 = vrcp.f32 %v651_v33 }
 0x344   : > { %1119 = vrcp.f32 %v655_v32 }
 0x34a   : > { %v1106_v15 = vpop.eup %1105 }
 0x34b   : > { %v1108_v58 = vpop.eup %1107  ;;  %v673_v57 = vmul.f32 %v1106_v15, %v1098_v5  ;;  %v786_v5 = vld [vmem:[#allocation5 + $0x10] sm:$0xff] }
 0x34c   : > { %v665_v38 = vmul.f32 %v1108_v58, %v1512_v16  ;;  %v1110_v29 = vpop.eup %1109 }
 0x34d   : > { %702 = vperm.xlu0 %1087, %v673_v57   ;;  %v667_v61 = vmul.f32 %v1110_v29, %v1517_v18  ;;  %v1112_v36 = vpop.eup %1111 }
 0x34e   : > { %682 = vperm.xlu1 %1088, %v665_v38   ;;  %v669_v40 = vmul.f32 %v1112_v36, %v1521_v19  ;;  %v1114_v0 = vpop.eup %1113  ;;  %v1250_v19 = vmov 0.0  }
 0x34f   : > { %v671_v16 = vmul.f32 %v1114_v0, %v1524_v23  ;;  %v1116_v17 = vpop.eup %1115  ;;  %1014 = vmatprep.subr.mxu0 %v1250_v19  ;;  %1022 = vmatprep.mubr.msk.f32.mxu0 %vm1251_vm9, %v1250_v19  ;;  %v785_v23 = vld [vmem:[#allocation5 + $0x8] sm:$0xff] }
 0x350   : > { %v675_v42 = vmul.f32 %v1116_v17, %v1527_v24  ;;  %v1118_v63 = vpop.eup %1117  ;;  %1015 = vmatpush3.msra.mxu0 %v787_v20  ;;  %v784_v24 = vld [vmem:[#allocation5] sm:$0xff] }
 0x351   : > { %v677_v18 = vmul.f32 %v1118_v63, %v1530_v11  ;;  %v1120_v7 = vpop.eup %1119  ;;  %1016 = vmatprep.subr.mxu0 %v1250_v19 }
 0x352   : > { %687 = vperm.xlu1 %1088, %v667_v61   ;;  %v679_v44 = vmul.f32 %v1120_v7, %v1533_v25  ;;  %1017 = vmatpush3.msra.mxu0 %v786_v5 }
 0x353   : > { %1018 = vmatprep.subr.mxu0 %v1250_v19 }
 0x354   : > { %1019 = vmatpush3.msra.mxu0 %v785_v23 }
 0x355   : > { %1020 = vmatprep.subr.mxu0 %v1250_v19 }
 0x356   : > { %692 = vperm.xlu1 %1088, %v669_v40   ;;  %1021 = vmatpush3.msra.mxu0 %v784_v24 }
 0x35a   : > { %697 = vperm.xlu1 %1088, %v671_v16  }
 0x35e   : > { %707 = vperm.xlu1 %1088, %v675_v42  }
 0x362   : > { %712 = vperm.xlu1 %1088, %v677_v18  }
 0x366   : > { %717 = vperm.xlu1 %1088, %v679_v44  }
 0x3c8   : > { %v703_v27 = vpop.permute.xlu0 %702 }
 0x3c9   : > { %v683_v11 = vpop.permute.xlu1 %682  ;;  %v724_v34 = vmul.f32 %v703_v27, %v1436_v14 }
 0x3ca   : > { %v720_v26 = vmul.f32 %v683_v11, %v1424_v6 }
 0x3cb   : > { %v756_v45 = vsel %vm299_vm0, %v724_v34, 0.0 }
 0x3cc   : > { %v728_v30 = vsel %vm299_vm0, %v720_v26, 0.0  ;;  %v757_v50 = vrot.slane %v756_v45, 4 }
 0x3cd   : > { %v688_v25 = vpop.permute.xlu1 %687  ;;  %v729_v39 = vrot.slane %v728_v30, 4 }
 0x3ce   : > { %v721_v28 = vmul.f32 %v688_v25, %v1430_v10  ;;  %v758_v59 = vadd.f32 %v757_v50, %v756_v45 }
 0x3cf   : > { %v730_v48 = vadd.f32 %v729_v39, %v728_v30 }
 0x3d0   : > { %v735_v31 = vsel %vm299_vm0, %v721_v28, 0.0  ;;  %v759_v57 = vrot.slane %v758_v59, 2 }
 0x3d1   : > { %v736_v35 = vrot.slane %v735_v31, 4  ;;  %v693_v37 = vpop.permute.xlu1 %692  ;;  %v731_v54 = vrot.slane %v730_v48, 2 }
 0x3d2   : > { %v722_v41 = vmul.f32 %v693_v37, %v1419_v4  ;;  %v760_v42 = vadd.f32 %v759_v57, %v758_v59 }
 0x3d3   : > { %v737_v6 = vadd.f32 %v736_v35, %v735_v31 }
 0x3d4   : > { %v742_v43 = vsel %vm299_vm0, %v722_v41, 0.0  ;;  %v761_v11 = vrot.slane %v760_v42, 1 }
 0x3d5   : > { %v743_v46 = vrot.slane %v742_v43, 4  ;;  %v698_v47 = vpop.permute.xlu1 %697  ;;  %v738_v14 = vrot.slane %v737_v6, 2 }
 0x3d6   : > { %v723_v10 = vmul.f32 %v698_v47, %v1428_v9  ;;  %v732_v9 = vadd.f32 %v731_v54, %v730_v48  ;;  %v762_v34 = vadd.f32 %v761_v11, %v760_v42 }
 0x3d7   : > { %v744_v49 = vadd.f32 %v743_v46, %v742_v43  ;;  %v739_v62 = vadd.f32 %v738_v14, %v737_v6  ;;  %v1002_v46 = vld [vmem:[%s1641_s4] ss:$0 sm:$0xff] }
 0x3d8   : > { %v749_v51 = vsel %vm299_vm0, %v723_v10, 0.0  ;;  %v733_v32 = vrot.slane %v732_v9, 1 }
 0x3d9   : > { %v750_v52 = vrot.slane %v749_v51, 4  ;;  %v708_v53 = vpop.permute.xlu1 %707  ;;  %v745_v55 = vrot.slane %v744_v49, 2  ;;  %v740_v33 = vrot.slane %v739_v62, 1 }
 0x3da   : > { %v725_v4 = vmul.f32 %v708_v53, %v1434_v13  ;;  %v734_v44 = vadd.f32 %v733_v32, %v732_v9 }
 0x3db   : > { %v751_v56 = vadd.f32 %v750_v52, %v749_v51  ;;  %v746_v3 = vadd.f32 %v745_v55, %v744_v49 }
 0x3dc   : > { %v763_v60 = vsel %vm299_vm0, %v725_v4, 0.0 }
 0x3dd   : > { %v752_v1 = vrot.slane %v751_v56, 2  ;;  %v764_v2 = vrot.slane %v763_v60, 4  ;;  %v713_v8 = vpop.permute.xlu1 %712  ;;  %v747_v36 = vrot.slane %v746_v3, 1 }
 0x3de   : > { %v726_v12 = vmul.f32 %v713_v8, %v1446_v22  ;;  %v741_v22 = vadd.f32 %v740_v33, %v739_v62 }
 0x3df   : > { %v753_v15 = vadd.f32 %v752_v1, %v751_v56  ;;  %v765_v58 = vadd.f32 %v764_v2, %v763_v60  ;;  %v748_v20 = vadd.f32 %v747_v36, %v746_v3 }
 0x3e0   : > { %v770_v38 = vsel %vm299_vm0, %v726_v12, 0.0  ;;  %v803_v26 = vsel %vm464_vm1, %v741_v22, %v734_v44 }
 0x3e1   : > { %v766_v29 = vrot.slane %v765_v58, 2  ;;  %v771_v13 = vrot.slane %v770_v38, 4  ;;  %v718_v61 = vpop.permute.xlu1 %717  ;;  %v754_v0 = vrot.slane %v753_v15, 1  ;;  %v804_v27 = vsel %vm466_vm2, %v748_v20, %v803_v26 }
 0x3e2   : > { %v727_v40 = vmul.f32 %v718_v61, %v1444_v21 }
 0x3e3   : > { %v767_v16 = vadd.f32 %v766_v29, %v765_v58  ;;  %v772_v17 = vadd.f32 %v771_v13, %v770_v38  ;;  %v755_v19 = vadd.f32 %v754_v0, %v753_v15 }
 0x3e4   : > { %v777_v63 = vsel %vm299_vm0, %v727_v40, 0.0 }
 0x3e5   : > { %v773_v18 = vrot.slane %v772_v17, 2  ;;  %v778_v7 = vrot.slane %v777_v63, 4  ;;  %v768_v5 = vrot.slane %v767_v16, 1  ;;  %v805_v28 = vsel %vm468_vm3, %v755_v19, %v804_v27 }
 0x3e6   : > { %v806_v39 = vsel %vm470_vm4, %v762_v34, %v805_v28 }
 0x3e7   : > { %v774_v23 = vadd.f32 %v773_v18, %v772_v17  ;;  %v779_v24 = vadd.f32 %v778_v7, %v777_v63  ;;  %v769_v30 = vadd.f32 %v768_v5, %v767_v16 }
 0x3e9   : > { %v775_v21 = vrot.slane %v774_v23, 1  ;;  %v780_v25 = vrot.slane %v779_v24, 2  ;;  %v807_v43 = vsel %vm472_vm5, %v769_v30, %v806_v39 }
 0x3eb   : > { %v781_v31 = vadd.f32 %v780_v25, %v779_v24  ;;  %v776_v35 = vadd.f32 %v775_v21, %v774_v23 }
 0x3ed   : > { %v782_v37 = vrot.slane %v781_v31, 1  ;;  %v808_v45 = vsel %vm474_vm6, %v776_v35, %v807_v43 }
 0x3ef   : > { %v783_v41 = vadd.f32 %v782_v37, %v781_v31 }
 0x3f1   : > { %v809_v6 = vsel %vm476_vm7, %v783_v41, %v808_v45 }
 0x3f2   : > { %1023 = vmatmul.mubr.msk.f32.vlgmr.msra.gmra.mxu0 %vm299_vm0, %v809_v6 }
 0x4b2   : > { %v878_v47 = vpop.f32.mrf.mxu0 }
 0x4b3   : > { %v879_v48 = vadd.f32 %v1002_v46, %v878_v47 }
 0x4b4   : > { %v1024_v10 = vpop.f32.mrf.mxu0 }
 0x4b5   : > { %882 = vst.msk [vmem:[%s270_s11] sm:$0xff] %vm299_vm0, %v879_v48 }
 0x4b6   : > { %1188 = shalt.err (!%p1185_p5)
}
 0x4b7   : > { %s1189_s7 = scalar_lea.hbm %s1599_s26, 128  ;;  %s1193_s27 = scalar_lea.hbm %s1642_s5, 256 }
 0x4b8   : > { %p1190_p2 = scmp.ne.s32.totalorder %s1599_s26, %s1189_s7  ;;  %p1194_p6 = scmp.lt.s32.totalorder %s1599_s26, %s1642_s5 }
 0x4b9   : > { %p1195_p8 = scmp.lt.s32.totalorder %s1193_s27, %s1189_s7 }
 0x4ba   : > { %p1191_p1 = pnand %p1190_p2, %p1660_p7 }
 0x4bb   : > { %p1196_p3 = por %p1195_p8, %p1194_p6 }
 0x4bc   : > { %p1192_p4 = pneg %p1191_p1 }
 0x4be   : > { %p1197_p11 = pnand %p1196_p3, %p1192_p4 }
 0x4c0   : > { %1200 = shalt.err (!%p1197_p11)
}
 0x4c1   : > { %1031 = dma.vmem_to_hbm [thread:$0]  (%p1660_p7), %s898_s9, 128, %s1599_s26, %s884_s10  }
 0x4c2 PF: > { %s909_s12 = sand.u32 1, %s1231_s18   ;;  %p1661_p9 = scmp.ne.s32.totalorder %s1649_s25, 0 }
 0x4c3   : > { %p1662_p10 = scmp.ge.s32.totalorder %s1243_s21, 2  ;;  %s910_s11 = scalar_lea.sflag [#allocation4], %s909_s12 }
 0x4c5   : > { %p1042_p12 = pnand %p1662_p10, %p1661_p9 }
 0x4c7   : > { %p1043_p13 = pneg %p1042_p12 }
 0x4c9   : > { %1226 = dma.done.wait (%p1043_p13), %s910_s11, 128  }
 0x4ca   : > { %1228 = vsyncadd (%p1043_p13), %s910_s11, 4294967168  ;;  %p19_p0 = scmp.ge.s32.totalorder %s1337_s30, 4   ;;  %s1663_s18 = smov %s1235_s19 }
 0x4cb   : > { %s1664_s19 = smov %s1239_s20  ;;  %s1665_s20 = smov %s1357_s13 }
 0x4cc   : > { %s1666_s21 = smov %s1337_s30  ;;  %21 = sbr.rel (!%p19_p0) target bundleno = 6 (0x6), region = 92 }
 0x4d1   :  { %915 = vsyncpa [#allocation3], 1 }
 0x4d2   :  { %917 = vsyncpa [#allocation3 + $0x1], 1 }
 0x4d3   :  { %918 = vsyncpa [#allocation6], 1 }
 0x4d4   :  { %919 = vsyncpa [#allocation4], 1 }
 0x4d5   :  { %921 = vsyncpa [#allocation4 + $0x1], 1 }

</bundles_post_ra>
